<compile_context>
chip_gen: v5e
topology: v5e:2x2
jax: 0.10.0
libtpu: 0.0.40
codegen_flags: <defaults>
</compile_context>

<pallas_src>
import jax
import jax.numpy as jnp
from jax.experimental import pallas as pl
from jax.experimental.pallas import tpu as pltpu

C_IN = 6
C_OUT = 3
EPS = 1e-5
LANE = 128


def _device_config():
    """Per-generation row-block cap (rows of 128 lanes) and scoped-VMEM limit."""
    try:
        kind = jax.devices()[0].device_kind.lower()
    except Exception:
        kind = ""
    if ("v5" in kind) or ("v6" in kind):
        # 128 MiB physical VMEM, 1 TensorCore.  Double-buffered in+out at
        # R=2048 is ~19 MiB; raise the scoped limit well above the default.
        return {"r_cap": 2048, "vmem_limit": 96 * 1024 * 1024, "cores": 1}
    # v7x (64 MiB VMEM, 2 TensorCores) or unknown hardware: conservative cap.
    return {"r_cap": 1024, "vmem_limit": 40 * 1024 * 1024, "cores": 2}


def _choose_block_rows(rt, n, r_cap, cores):
    """Rows (of 128 lanes) per block: a multiple of 8, or the full extent."""
    if rt <= 8:
        return rt                      # full-extent block (allowed even if < 8)
    r = (min(r_cap, rt) // 8) * 8
    if cores > 1 and n == 1:
        # Keep >= 2 programs on the parallel row axis so both TCs get work.
        r = min(r, max(8, (pl.cdiv(rt, 2) // 8) * 8))
    return r


def _head2_kernel(scale_ref, shift_ref, w_ref, b_ref, x_ref, o_ref):
    """BN(6) -> ReLU -> 1x1 Conv(6->3) on one (1, C, R, 128) spatial block.

    Params live in SMEM (scalar prefetch); every operation is a
    scalar * (R,128)-slab FMA on the VPU. No MXU, no cross-lane work.
    """
    acc = [None] * C_OUT
    for k in range(C_IN):
        # BatchNorm folded to a single FMA, then ReLU.
        xr = jnp.maximum(x_ref[0, k] * scale_ref[k] + shift_ref[k], 0.0)
        # Accumulate this input channel's contribution to each output channel.
        for c in range(C_OUT):
            term = xr * w_ref[c * C_IN + k]
            acc[c] = term if acc[c] is None else acc[c] + term
    for c in range(C_OUT):
        o_ref[0, c] = (acc[c] + b_ref[c]).astype(o_ref.dtype)


def head2_pallas(x4, scale, shift, w_flat, bias, *, block_rows, vmem_limit):
    """x4: (N, C_IN, RT, 128) f32.  Returns (N, C_OUT, RT, 128) f32."""
    n, _, rt, _ = x4.shape
    grid = (n, pl.cdiv(rt, block_rows))
    idx = lambda i, t, *prefetch: (i, 0, t, 0)

    return pl.pallas_call(
        _head2_kernel,
        out_shape=jax.ShapeDtypeStruct((n, C_OUT, rt, LANE), jnp.float32),
        grid_spec=pltpu.PrefetchScalarGridSpec(
            num_scalar_prefetch=4,  # scale, shift, w_flat, bias -> SMEM
            grid=grid,
            in_specs=[pl.BlockSpec((1, C_IN, block_rows, LANE), idx)],
            out_specs=pl.BlockSpec((1, C_OUT, block_rows, LANE), idx),
        ),
        compiler_params=pltpu.CompilerParams(
            dimension_semantics=("parallel", "parallel"),
            vmem_limit_bytes=vmem_limit,
        ),
    )(scale, shift, w_flat, bias, x4)


def new_model_dn_forward(x_nchw, params):
    """Full forward: model_dn (identity stand-in) + head_2 Pallas kernel.

    x_nchw: (N, 6, H, W) float32.  Returns (N, 3, H, W) float32.
    """
    # TODO(synk): `model_dn` is an externally provided backbone with no
    # architecture defined in this module; treated as identity here.
    x = x_nchw

    n, c, h, w = x.shape
    assert c == C_IN
    hw = h * w
    rt = -(-hw // LANE)              # rows of 128 lanes
    hw_pad = rt * LANE

    # Free (view) reshape NCHW -> (N, C, HW); pad at most 127 lanes so the
    # spatial axis splits cleanly into (RT, 128).  No pad-to-tile-multiple.
    x3 = x.reshape(n, C_IN, hw)
    if hw_pad != hw:
        x3 = jnp.pad(x3, ((0, 0), (0, 0), (0, hw_pad - hw)))
    x4 = x3.reshape(n, C_IN, rt, LANE)

    # Fold BatchNorm (inference stats) into one scale/shift per channel.
    scale = (params["bn_gamma"] * jax.lax.rsqrt(params["bn_var"] + EPS)).astype(jnp.float32)
    shift = (params["bn_beta"] - params["bn_mean"] * scale).astype(jnp.float32)
    w_flat = params["conv_w"].reshape(C_OUT * C_IN).astype(jnp.float32)
    bias = params["conv_b"].astype(jnp.float32)

    cfg = _device_config()
    block_rows = _choose_block_rows(rt, n, cfg["r_cap"], cfg["cores"])

    y4 = head2_pallas(x4, scale, shift, w_flat, bias,
                      block_rows=block_rows, vmem_limit=cfg["vmem_limit"])

    y3 = y4.reshape(n, C_OUT, hw_pad)
    if hw_pad != hw:
        y3 = y3[:, :, :hw]
    return y3.reshape(n, C_OUT, h, w)


def init_params(key):
    k1, k2, k3, k4, k5 = jax.random.split(key, 5)
    return {
        # BatchNorm2d(6): affine params + running stats (inference semantics)
        "bn_gamma": 1.0 + 0.1 * jax.random.normal(k1, (C_IN,), jnp.float32),
        "bn_beta": 0.1 * jax.random.normal(k2, (C_IN,), jnp.float32),
        "bn_mean": 0.05 * jax.random.normal(k3, (C_IN,), jnp.float32),
        "bn_var": 1.0 + 0.1 * jnp.abs(jax.random.normal(k4, (C_IN,), jnp.float32)),
        # Conv2d(6, 3, kernel_size=1)
        "conv_w": 0.1 * jax.random.normal(k5, (C_OUT, C_IN, 1, 1), jnp.float32),
        "conv_b": jnp.linspace(-0.1, 0.1, C_OUT, dtype=jnp.float32),
    }


def reference_forward(x, p):
    """Pure-JAX reference of head_2 for validation."""
    g = p["bn_gamma"].reshape(1, C_IN, 1, 1)
    b = p["bn_beta"].reshape(1, C_IN, 1, 1)
    m = p["bn_mean"].reshape(1, C_IN, 1, 1)
    v = p["bn_var"].reshape(1, C_IN, 1, 1)
    xn = (x - m) / jnp.sqrt(v + EPS) * g + b
    xr = jnp.maximum(xn, 0.0)
    w = p["conv_w"].reshape(C_OUT, C_IN)
    y = jnp.einsum("oc,nchw->nohw", w, xr) + p["conv_b"].reshape(1, C_OUT, 1, 1)
    return y


if __name__ == "__main__":
    key = jax.random.PRNGKey(0)
    kx, kp = jax.random.split(key)

    # Small deterministic input: batch=2, channels=6 (head input), 16x16.
    N, H, W = 2, 16, 16
    x = jax.random.normal(kx, (N, C_IN, H, W), jnp.float32)
    params = init_params(kp)

    out = jax.jit(new_model_dn_forward)(x, params)
    out = jax.block_until_ready(out)

    ref = reference_forward(x, params)
    assert out.shape == (N, C_OUT, H, W)
    assert jnp.allclose(out, ref, atol=1e-4, rtol=1e-4)

    print("KERNEL_OK")
</pallas_src>

<mosaic_0001>
module attributes {stable_mosaic.version = 11 : i64} {
  func.func @_head2_kernel(%arg0: i32, %arg1: i32, %arg2: memref<6xf32, #tpu.memory_space<smem>>, %arg3: memref<6xf32, #tpu.memory_space<smem>>, %arg4: memref<18xf32, #tpu.memory_space<smem>>, %arg5: memref<3xf32, #tpu.memory_space<smem>>, %arg6: memref<1x6x2x128xf32, #tpu.memory_space<vmem>>, %arg7: memref<1x3x2x128xf32, #tpu.memory_space<vmem>>) attributes {dimension_semantics = [#tpu.dimension_semantics<parallel>, #tpu.dimension_semantics<parallel>], iteration_bounds = array<i64: 2, 1>, scalar_prefetch = 4 : i64, scratch_operands = 0 : i64, tpu.core_type = #tpu.core_type<tc>, window_params = [{transform_indices = @transform_0, window_bounds = array<i64: 1, 6, 2, 128>}, {transform_indices = @transform_1, window_bounds = array<i64: 1, 3, 2, 128>}]} {
    %c0 = arith.constant 0 : index
    %c0_0 = arith.constant 0 : index
    %c0_1 = arith.constant 0 : index
    %c0_2 = arith.constant 0 : index
    %0 = vector.load %arg6[%c0, %c0_0, %c0_1, %c0_2] : memref<1x6x2x128xf32, #tpu.memory_space<vmem>>, vector<1x1x2x128xf32>
    %1 = vector.shape_cast %0 : vector<1x1x2x128xf32> to vector<2x128xf32>
    %c0_3 = arith.constant 0 : index
    %2 = memref.load %arg2[%c0_3] : memref<6xf32, #tpu.memory_space<smem>>
    %3 = vector.broadcast %2 : f32 to vector<2x128xf32>
    %4 = arith.mulf %1, %3 : vector<2x128xf32>
    %c0_4 = arith.constant 0 : index
    %5 = memref.load %arg3[%c0_4] : memref<6xf32, #tpu.memory_space<smem>>
    %6 = vector.broadcast %5 : f32 to vector<2x128xf32>
    %7 = arith.addf %4, %6 : vector<2x128xf32>
    %cst = arith.constant 0.000000e+00 : f32
    %8 = vector.broadcast %cst : f32 to vector<2x128xf32>
    %9 = arith.maximumf %7, %8 : vector<2x128xf32>
    %c0_5 = arith.constant 0 : index
    %10 = memref.load %arg4[%c0_5] : memref<18xf32, #tpu.memory_space<smem>>
    %11 = vector.broadcast %10 : f32 to vector<2x128xf32>
    %12 = arith.mulf %9, %11 : vector<2x128xf32>
    %c6 = arith.constant 6 : index
    %13 = memref.load %arg4[%c6] : memref<18xf32, #tpu.memory_space<smem>>
    %14 = vector.broadcast %13 : f32 to vector<2x128xf32>
    %15 = arith.mulf %9, %14 : vector<2x128xf32>
    %c12 = arith.constant 12 : index
    %16 = memref.load %arg4[%c12] : memref<18xf32, #tpu.memory_space<smem>>
    %17 = vector.broadcast %16 : f32 to vector<2x128xf32>
    %18 = arith.mulf %9, %17 : vector<2x128xf32>
    %c0_6 = arith.constant 0 : index
    %c1 = arith.constant 1 : index
    %c0_7 = arith.constant 0 : index
    %c0_8 = arith.constant 0 : index
    %19 = vector.load %arg6[%c0_6, %c1, %c0_7, %c0_8] : memref<1x6x2x128xf32, #tpu.memory_space<vmem>>, vector<1x1x2x128xf32>
    %20 = vector.shape_cast %19 : vector<1x1x2x128xf32> to vector<2x128xf32>
    %c1_9 = arith.constant 1 : index
    %21 = memref.load %arg2[%c1_9] : memref<6xf32, #tpu.memory_space<smem>>
    %22 = vector.broadcast %21 : f32 to vector<2x128xf32>
    %23 = arith.mulf %20, %22 : vector<2x128xf32>
    %c1_10 = arith.constant 1 : index
    %24 = memref.load %arg3[%c1_10] : memref<6xf32, #tpu.memory_space<smem>>
    %25 = vector.broadcast %24 : f32 to vector<2x128xf32>
    %26 = arith.addf %23, %25 : vector<2x128xf32>
    %cst_11 = arith.constant 0.000000e+00 : f32
    %27 = vector.broadcast %cst_11 : f32 to vector<2x128xf32>
    %28 = arith.maximumf %26, %27 : vector<2x128xf32>
    %c1_12 = arith.constant 1 : index
    %29 = memref.load %arg4[%c1_12] : memref<18xf32, #tpu.memory_space<smem>>
    %30 = vector.broadcast %29 : f32 to vector<2x128xf32>
    %31 = arith.mulf %28, %30 : vector<2x128xf32>
    %32 = arith.addf %12, %31 : vector<2x128xf32>
    %c7 = arith.constant 7 : index
    %33 = memref.load %arg4[%c7] : memref<18xf32, #tpu.memory_space<smem>>
    %34 = vector.broadcast %33 : f32 to vector<2x128xf32>
    %35 = arith.mulf %28, %34 : vector<2x128xf32>
    %36 = arith.addf %15, %35 : vector<2x128xf32>
    %c13 = arith.constant 13 : index
    %37 = memref.load %arg4[%c13] : memref<18xf32, #tpu.memory_space<smem>>
    %38 = vector.broadcast %37 : f32 to vector<2x128xf32>
    %39 = arith.mulf %28, %38 : vector<2x128xf32>
    %40 = arith.addf %18, %39 : vector<2x128xf32>
    %c0_13 = arith.constant 0 : index
    %c2 = arith.constant 2 : index
    %c0_14 = arith.constant 0 : index
    %c0_15 = arith.constant 0 : index
    %41 = vector.load %arg6[%c0_13, %c2, %c0_14, %c0_15] : memref<1x6x2x128xf32, #tpu.memory_space<vmem>>, vector<1x1x2x128xf32>
    %42 = vector.shape_cast %41 : vector<1x1x2x128xf32> to vector<2x128xf32>
    %c2_16 = arith.constant 2 : index
    %43 = memref.load %arg2[%c2_16] : memref<6xf32, #tpu.memory_space<smem>>
    %44 = vector.broadcast %43 : f32 to vector<2x128xf32>
    %45 = arith.mulf %42, %44 : vector<2x128xf32>
    %c2_17 = arith.constant 2 : index
    %46 = memref.load %arg3[%c2_17] : memref<6xf32, #tpu.memory_space<smem>>
    %47 = vector.broadcast %46 : f32 to vector<2x128xf32>
    %48 = arith.addf %45, %47 : vector<2x128xf32>
    %cst_18 = arith.constant 0.000000e+00 : f32
    %49 = vector.broadcast %cst_18 : f32 to vector<2x128xf32>
    %50 = arith.maximumf %48, %49 : vector<2x128xf32>
    %c2_19 = arith.constant 2 : index
    %51 = memref.load %arg4[%c2_19] : memref<18xf32, #tpu.memory_space<smem>>
    %52 = vector.broadcast %51 : f32 to vector<2x128xf32>
    %53 = arith.mulf %50, %52 : vector<2x128xf32>
    %54 = arith.addf %32, %53 : vector<2x128xf32>
    %c8 = arith.constant 8 : index
    %55 = memref.load %arg4[%c8] : memref<18xf32, #tpu.memory_space<smem>>
    %56 = vector.broadcast %55 : f32 to vector<2x128xf32>
    %57 = arith.mulf %50, %56 : vector<2x128xf32>
    %58 = arith.addf %36, %57 : vector<2x128xf32>
    %c14 = arith.constant 14 : index
    %59 = memref.load %arg4[%c14] : memref<18xf32, #tpu.memory_space<smem>>
    %60 = vector.broadcast %59 : f32 to vector<2x128xf32>
    %61 = arith.mulf %50, %60 : vector<2x128xf32>
    %62 = arith.addf %40, %61 : vector<2x128xf32>
    %c0_20 = arith.constant 0 : index
    %c3 = arith.constant 3 : index
    %c0_21 = arith.constant 0 : index
    %c0_22 = arith.constant 0 : index
    %63 = vector.load %arg6[%c0_20, %c3, %c0_21, %c0_22] : memref<1x6x2x128xf32, #tpu.memory_space<vmem>>, vector<1x1x2x128xf32>
    %64 = vector.shape_cast %63 : vector<1x1x2x128xf32> to vector<2x128xf32>
    %c3_23 = arith.constant 3 : index
    %65 = memref.load %arg2[%c3_23] : memref<6xf32, #tpu.memory_space<smem>>
    %66 = vector.broadcast %65 : f32 to vector<2x128xf32>
    %67 = arith.mulf %64, %66 : vector<2x128xf32>
    %c3_24 = arith.constant 3 : index
    %68 = memref.load %arg3[%c3_24] : memref<6xf32, #tpu.memory_space<smem>>
    %69 = vector.broadcast %68 : f32 to vector<2x128xf32>
    %70 = arith.addf %67, %69 : vector<2x128xf32>
    %cst_25 = arith.constant 0.000000e+00 : f32
    %71 = vector.broadcast %cst_25 : f32 to vector<2x128xf32>
    %72 = arith.maximumf %70, %71 : vector<2x128xf32>
    %c3_26 = arith.constant 3 : index
    %73 = memref.load %arg4[%c3_26] : memref<18xf32, #tpu.memory_space<smem>>
    %74 = vector.broadcast %73 : f32 to vector<2x128xf32>
    %75 = arith.mulf %72, %74 : vector<2x128xf32>
    %76 = arith.addf %54, %75 : vector<2x128xf32>
    %c9 = arith.constant 9 : index
    %77 = memref.load %arg4[%c9] : memref<18xf32, #tpu.memory_space<smem>>
    %78 = vector.broadcast %77 : f32 to vector<2x128xf32>
    %79 = arith.mulf %72, %78 : vector<2x128xf32>
    %80 = arith.addf %58, %79 : vector<2x128xf32>
    %c15 = arith.constant 15 : index
    %81 = memref.load %arg4[%c15] : memref<18xf32, #tpu.memory_space<smem>>
    %82 = vector.broadcast %81 : f32 to vector<2x128xf32>
    %83 = arith.mulf %72, %82 : vector<2x128xf32>
    %84 = arith.addf %62, %83 : vector<2x128xf32>
    %c0_27 = arith.constant 0 : index
    %c4 = arith.constant 4 : index
    %c0_28 = arith.constant 0 : index
    %c0_29 = arith.constant 0 : index
    %85 = vector.load %arg6[%c0_27, %c4, %c0_28, %c0_29] : memref<1x6x2x128xf32, #tpu.memory_space<vmem>>, vector<1x1x2x128xf32>
    %86 = vector.shape_cast %85 : vector<1x1x2x128xf32> to vector<2x128xf32>
    %c4_30 = arith.constant 4 : index
    %87 = memref.load %arg2[%c4_30] : memref<6xf32, #tpu.memory_space<smem>>
    %88 = vector.broadcast %87 : f32 to vector<2x128xf32>
    %89 = arith.mulf %86, %88 : vector<2x128xf32>
    %c4_31 = arith.constant 4 : index
    %90 = memref.load %arg3[%c4_31] : memref<6xf32, #tpu.memory_space<smem>>
    %91 = vector.broadcast %90 : f32 to vector<2x128xf32>
    %92 = arith.addf %89, %91 : vector<2x128xf32>
    %cst_32 = arith.constant 0.000000e+00 : f32
    %93 = vector.broadcast %cst_32 : f32 to vector<2x128xf32>
    %94 = arith.maximumf %92, %93 : vector<2x128xf32>
    %c4_33 = arith.constant 4 : index
    %95 = memref.load %arg4[%c4_33] : memref<18xf32, #tpu.memory_space<smem>>
    %96 = vector.broadcast %95 : f32 to vector<2x128xf32>
    %97 = arith.mulf %94, %96 : vector<2x128xf32>
    %98 = arith.addf %76, %97 : vector<2x128xf32>
    %c10 = arith.constant 10 : index
    %99 = memref.load %arg4[%c10] : memref<18xf32, #tpu.memory_space<smem>>
    %100 = vector.broadcast %99 : f32 to vector<2x128xf32>
    %101 = arith.mulf %94, %100 : vector<2x128xf32>
    %102 = arith.addf %80, %101 : vector<2x128xf32>
    %c16 = arith.constant 16 : index
    %103 = memref.load %arg4[%c16] : memref<18xf32, #tpu.memory_space<smem>>
    %104 = vector.broadcast %103 : f32 to vector<2x128xf32>
    %105 = arith.mulf %94, %104 : vector<2x128xf32>
    %106 = arith.addf %84, %105 : vector<2x128xf32>
    %c0_34 = arith.constant 0 : index
    %c5 = arith.constant 5 : index
    %c0_35 = arith.constant 0 : index
    %c0_36 = arith.constant 0 : index
    %107 = vector.load %arg6[%c0_34, %c5, %c0_35, %c0_36] : memref<1x6x2x128xf32, #tpu.memory_space<vmem>>, vector<1x1x2x128xf32>
    %108 = vector.shape_cast %107 : vector<1x1x2x128xf32> to vector<2x128xf32>
    %c5_37 = arith.constant 5 : index
    %109 = memref.load %arg2[%c5_37] : memref<6xf32, #tpu.memory_space<smem>>
    %110 = vector.broadcast %109 : f32 to vector<2x128xf32>
    %111 = arith.mulf %108, %110 : vector<2x128xf32>
    %c5_38 = arith.constant 5 : index
    %112 = memref.load %arg3[%c5_38] : memref<6xf32, #tpu.memory_space<smem>>
    %113 = vector.broadcast %112 : f32 to vector<2x128xf32>
    %114 = arith.addf %111, %113 : vector<2x128xf32>
    %cst_39 = arith.constant 0.000000e+00 : f32
    %115 = vector.broadcast %cst_39 : f32 to vector<2x128xf32>
    %116 = arith.maximumf %114, %115 : vector<2x128xf32>
    %c5_40 = arith.constant 5 : index
    %117 = memref.load %arg4[%c5_40] : memref<18xf32, #tpu.memory_space<smem>>
    %118 = vector.broadcast %117 : f32 to vector<2x128xf32>
    %119 = arith.mulf %116, %118 : vector<2x128xf32>
    %120 = arith.addf %98, %119 : vector<2x128xf32>
    %c11 = arith.constant 11 : index
    %121 = memref.load %arg4[%c11] : memref<18xf32, #tpu.memory_space<smem>>
    %122 = vector.broadcast %121 : f32 to vector<2x128xf32>
    %123 = arith.mulf %116, %122 : vector<2x128xf32>
    %124 = arith.addf %102, %123 : vector<2x128xf32>
    %c17 = arith.constant 17 : index
    %125 = memref.load %arg4[%c17] : memref<18xf32, #tpu.memory_space<smem>>
    %126 = vector.broadcast %125 : f32 to vector<2x128xf32>
    %127 = arith.mulf %116, %126 : vector<2x128xf32>
    %128 = arith.addf %106, %127 : vector<2x128xf32>
    %c0_41 = arith.constant 0 : index
    %129 = memref.load %arg5[%c0_41] : memref<3xf32, #tpu.memory_space<smem>>
    %130 = vector.broadcast %129 : f32 to vector<2x128xf32>
    %131 = arith.addf %120, %130 : vector<2x128xf32>
    %c0_42 = arith.constant 0 : index
    %c0_43 = arith.constant 0 : index
    %c0_44 = arith.constant 0 : index
    %c0_45 = arith.constant 0 : index
    %132 = vector.load %arg7[%c0_42, %c0_43, %c0_44, %c0_45] : memref<1x3x2x128xf32, #tpu.memory_space<vmem>>, vector<1x1x2x128xf32>
    %133 = vector.shape_cast %132 : vector<1x1x2x128xf32> to vector<2x128xf32>
    %134 = vector.shape_cast %131 : vector<2x128xf32> to vector<1x1x2x128xf32>
    tpu.vector_store %arg7[%c0_42, %c0_43, %c0_44, %c0_45], %134 {strides = array<i32>} : memref<1x3x2x128xf32, #tpu.memory_space<vmem>>, vector<1x1x2x128xf32>,
    %c1_46 = arith.constant 1 : index
    %135 = memref.load %arg5[%c1_46] : memref<3xf32, #tpu.memory_space<smem>>
    %136 = vector.broadcast %135 : f32 to vector<2x128xf32>
    %137 = arith.addf %124, %136 : vector<2x128xf32>
    %c0_47 = arith.constant 0 : index
    %c1_48 = arith.constant 1 : index
    %c0_49 = arith.constant 0 : index
    %c0_50 = arith.constant 0 : index
    %138 = vector.load %arg7[%c0_47, %c1_48, %c0_49, %c0_50] : memref<1x3x2x128xf32, #tpu.memory_space<vmem>>, vector<1x1x2x128xf32>
    %139 = vector.shape_cast %138 : vector<1x1x2x128xf32> to vector<2x128xf32>
    %140 = vector.shape_cast %137 : vector<2x128xf32> to vector<1x1x2x128xf32>
    tpu.vector_store %arg7[%c0_47, %c1_48, %c0_49, %c0_50], %140 {strides = array<i32>} : memref<1x3x2x128xf32, #tpu.memory_space<vmem>>, vector<1x1x2x128xf32>,
    %c2_51 = arith.constant 2 : index
    %141 = memref.load %arg5[%c2_51] : memref<3xf32, #tpu.memory_space<smem>>
    %142 = vector.broadcast %141 : f32 to vector<2x128xf32>
    %143 = arith.addf %128, %142 : vector<2x128xf32>
    %c0_52 = arith.constant 0 : index
    %c2_53 = arith.constant 2 : index
    %c0_54 = arith.constant 0 : index
    %c0_55 = arith.constant 0 : index
    %144 = vector.load %arg7[%c0_52, %c2_53, %c0_54, %c0_55] : memref<1x3x2x128xf32, #tpu.memory_space<vmem>>, vector<1x1x2x128xf32>
    %145 = vector.shape_cast %144 : vector<1x1x2x128xf32> to vector<2x128xf32>
    %146 = vector.shape_cast %143 : vector<2x128xf32> to vector<1x1x2x128xf32>
    tpu.vector_store %arg7[%c0_52, %c2_53, %c0_54, %c0_55], %146 {strides = array<i32>} : memref<1x3x2x128xf32, #tpu.memory_space<vmem>>, vector<1x1x2x128xf32>,
    return
  }
  func.func @transform_0(%arg0: i32, %arg1: i32, %arg2: memref<6xf32, #tpu.memory_space<smem>>, %arg3: memref<6xf32, #tpu.memory_space<smem>>, %arg4: memref<18xf32, #tpu.memory_space<smem>>, %arg5: memref<3xf32, #tpu.memory_space<smem>>) -> (i32, i32, i32, i32) {
    %c0_i32 = arith.constant 0 : i32
    %c0_i32_0 = arith.constant 0 : i32
    %c0_i32_1 = arith.constant 0 : i32
    return %arg0, %c0_i32, %arg1, %c0_i32_0 : i32, i32, i32, i32
  }
  func.func @transform_1(%arg0: i32, %arg1: i32, %arg2: memref<6xf32, #tpu.memory_space<smem>>, %arg3: memref<6xf32, #tpu.memory_space<smem>>, %arg4: memref<18xf32, #tpu.memory_space<smem>>, %arg5: memref<3xf32, #tpu.memory_space<smem>>) -> (i32, i32, i32, i32) {
    %c0_i32 = arith.constant 0 : i32
    %c0_i32_0 = arith.constant 0 : i32
    %c0_i32_1 = arith.constant 0 : i32
    return %arg0, %c0_i32, %arg1, %c0_i32_0 : i32, i32, i32, i32
  }
}

</mosaic_0001>

<bundles_post_ra>
// kernel: new_model_dn_forward.1
= control target key start
LH: loop header
LB: loop body
LE: loop exit
PB: predicated region body
PF: predicated region fallthrough
CT: control target
= control target key end

     0   :  { %s543_s24 = smov [#allocation3]   ;;  %s544_s25 = smov [#allocation4]   ;;  %s678_s0 = inlined_call_operand.vmem [shape: f32[6], index: 0, kind: input, shape index: {}]   ;;  %s679_s4 = inlined_call_operand.vmem [shape: f32[2,6,2,128], index: 4, kind: input, shape index: {}]   ;;  %s680_s5 = inlined_call_operand.vmem [shape: f32[2,3,2,128], index: 5, kind: output, shape index: {}]   ;;  %s681_s1 = inlined_call_operand.vmem [shape: f32[6], index: 1, kind: input, shape index: {}]   ;;  %s682_s2 = inlined_call_operand.vmem [shape: f32[18], index: 2, kind: input, shape index: {}]   ;;  %s683_s3 = inlined_call_operand.vmem [shape: f32[3], index: 3, kind: input, shape index: {}]  }
   0x1   :  { %s11_s20 = sshll.u32 %s678_s0, 4  ;;  %s16_s23 = sshll.u32 %s681_s1, 4  ;;  %s12_s20 = int_to_ptr.vmem [resolvable:$true] %s11_s20  ;;  %s17_s23 = int_to_ptr.vmem [resolvable:$true] %s16_s23 }
   0x2   :  { %14 = dma.vmem_to_smem %s12_s20, 16, %s543_s24, [#allocation2] }
   0x3   :  { %19 = dma.vmem_to_smem %s17_s23, 16, %s544_s25, [#allocation2] }
   0x4   :  { %s21_s28 = sshll.u32 %s682_s2, 4  ;;  %s26_s6 = sshll.u32 %s683_s3, 4  ;;  %s22_s28 = int_to_ptr.vmem [resolvable:$true] %s21_s28  ;;  %s27_s6 = int_to_ptr.vmem [resolvable:$true] %s26_s6 }
   0x5   :  { %s545_s0 = smov [#allocation5]   ;;  %s546_s7 = smov [#allocation6]  }
   0x6   :  { %24 = dma.vmem_to_smem %s22_s28, 16, %s545_s0, [#allocation2] }
   0x7   :  { %29 = dma.vmem_to_smem %s27_s6, 16, %s546_s7, [#allocation2] }
   0x8   :  { %529 = dma.done.wait [#allocation2], 64 }
   0x9   :  { %530 = vsyncadd [#allocation2], 4294967232 }
   0xa   :  { %32 = sfence }
   0xb   :  { %s589_s1 = smov 0   ;;  %s591_s8 = smov 0  }
   0xc   :  { %s593_s9 = smov 0  }
   0xd LB: > { %s50_s2 = sadd.s32 1, %s537_s8  ;;  %p398_p0 = scmp.ge.s32.totalorder %s541_s9, 1  ;;  %s541_s9 = sphi %s593_s9, %s38_s9   ;;  %s537_s8 = sphi %s591_s8, %s685_s8   ;;  %s533_s1 = sphi %s589_s1, %s684_s1  }
   0xe   : > { %p52_p1 = scmp.ge.s32.totalorder %s50_s2, 2  ;;  %p133_p2 = scmp.lt.s32.totalorder %s541_s9, 3 }
  0x10   : > { %s687_s2 = smov (%p52_p1, %s50_s2), 0  ;;  %p134_p3 = pnand %p398_p0, %p133_p2 }
  0x11   : > { %p159_p4 = scmp.lt.s32.totalorder (!%p134_p3), %s533_s1, 1  ;;  %s176_s3 = sld [smem:[#allocation3]] (!%p134_p3) }
  0x12   : > { %137 = sbr.rel (%p134_p3) target bundleno = 67 (0x43), region = 24  ;;  %s179_s10 = sld [smem:[#allocation4]] (!%p134_p3) }
  0x13   : > { %s183_s11 = sld [smem:[#allocation5]] (!%p134_p3) }
  0x14   : > { %s404_s13 = sld [smem:[#allocation3 + $0x1]] (!%p134_p3) }
  0x15   : > { %s405_s14 = sld [smem:[#allocation4 + $0x1]] (!%p134_p3) }
  0x16   : > { %s406_s18 = sld [smem:[#allocation5 + $0x1]] (!%p134_p3) }
  0x17   : > { %s689_s1 = smov (!%p159_p4, %s533_s1), 1  ;;  %v177_v0 = vstv %s176_s3  ;;  %s410_s19 = sld [smem:[#allocation3 + $0x2]] }
  0x18   : > { %s439_s12 = smul.u32 12, %s689_s1  ;;  %v180_v2 = vstv %s179_s10  ;;  %s411_s20 = sld [smem:[#allocation4 + $0x2]] }
  0x19   : > { %s617_s21 = sld [smem:[#allocation5 + $0x2]]  ;;  %v184_v10 = vstv %s183_s11  ;;  %s440_s15 = smul.u32 6, %s689_s1 }
  0x1a   : > { %s613_s17 = scalar_lea.vmem %s679_s4, %s439_s12  ;;  %v195_v6 = vstv %s404_s13  ;;  %s416_s22 = sld [smem:[#allocation3 + $0x3]] }
  0x1b   : > { %v175_v1 = vld [vmem:[%s613_s17] sm:$0x3]  ;;  %v403_v4 = vld [vmem:[%s613_s17 + $0x2] sm:$0x3]  ;;  %v198_v8 = vstv %s405_s14  ;;  %v409_v11 = vld [vmem:[%s613_s17 + $0x4] sm:$0x3] }
  0x1c   : > { %v178_v3 = vmul.f32 %v177_v0, %v175_v1  ;;  %v196_v7 = vmul.f32 %v403_v4, %v195_v6  ;;  %s417_s23 = sld [smem:[#allocation4 + $0x3]]  ;;  %v202_v13 = vstv %s406_s18  ;;  %v415_v19 = vld [vmem:[%s613_s17 + $0x6] sm:$0x3]  ;;  %v421_v26 = vld [vmem:[%s613_s17 + $0x8] sm:$0x3] }
  0x1d   : > { %s622_s24 = sld [smem:[#allocation5 + $0x3]]  ;;  %v216_v14 = vstv %s410_s19  ;;  %v427_v35 = vld [vmem:[%s613_s17 + $0xa] sm:$0x3] }
  0x1e   : > { %v181_v5 = vadd.f32 %v180_v2, %v178_v3  ;;  %v199_v12 = vadd.f32 %v198_v8, %v196_v7  ;;  %s422_s25 = sld [smem:[#allocation3 + $0x4]]  ;;  %v217_v17 = vmul.f32 %v409_v11, %v216_v14  ;;  %v219_v18 = vstv %s411_s20 }
  0x1f   : > { %s423_s26 = sld [smem:[#allocation4 + $0x4]]  ;;  %v223_v23 = vstv %s617_s21  ;;  %s660_s21 = scalar_lea.vmem %s680_s5, %s440_s15 }
  0x20   : > { %v619_v9 = vmax.f32 %v181_v5, 0.0  ;;  %v625_v16 = vmax.f32 %v199_v12, 0.0  ;;  %s628_s27 = sld [smem:[#allocation5 + $0x4]]  ;;  %v220_v21 = vadd.f32 %v219_v18, %v217_v17  ;;  %v237_v22 = vstv %s416_s22 }
  0x21   : > { %s428_s28 = sld [smem:[#allocation3 + $0x5]]  ;;  %v238_v24 = vmul.f32 %v415_v19, %v237_v22 }
  0x22   : > { %v185_v15 = vmul.f32 %v184_v10, %v619_v9  ;;  %v203_v20 = vmul.f32 %v202_v13, %v625_v16  ;;  %v240_v25 = vstv %s417_s23  ;;  %s429_s29 = sld [smem:[#allocation4 + $0x5]]  ;;  %v633_v28 = vmax.f32 %v220_v21, 0.0 }
  0x23   : > { %s635_s30 = sld [smem:[#allocation5 + $0x5]]  ;;  %v241_v29 = vadd.f32 %v240_v25, %v238_v24  ;;  %v244_v32 = vstv %s622_s24 }
  0x24   : > { %v204_v27 = vadd.f32 %v203_v20, %v185_v15  ;;  %v258_v30 = vstv %s422_s25  ;;  %s637_s6 = sld [smem:[#allocation6]]  ;;  %v224_v31 = vmul.f32 %v223_v23, %v633_v28 }
  0x25   : > { %v259_v33 = vmul.f32 %v421_v26, %v258_v30  ;;  %v261_v34 = vstv %s423_s26  ;;  %s401_s0 = sld [smem:[#allocation5 + $0x6]]  ;;  %v242_v36 = vmax.f32 %v241_v29, 0.0 }
  0x26   : > { %s407_s7 = sld [smem:[#allocation5 + $0x7]]  ;;  %v225_v37 = vadd.f32 %v224_v31, %v204_v27  ;;  %v265_v41 = vstv %s628_s27 }
  0x27   : > { %v262_v38 = vadd.f32 %v261_v34, %v259_v33  ;;  %v279_v39 = vstv %s428_s28  ;;  %s413_s3 = sld [smem:[#allocation5 + $0x8]]  ;;  %v245_v40 = vmul.f32 %v244_v32, %v242_v36 }
  0x28   : > { %v280_v42 = vmul.f32 %v427_v35, %v279_v39  ;;  %v282_v43 = vstv %s429_s29  ;;  %s419_s10 = sld [smem:[#allocation5 + $0x9]] }
  0x29   : > { %v263_v44 = vmax.f32 %v262_v38, 0.0  ;;  %s643_s11 = sld [smem:[#allocation5 + $0xa]]  ;;  %v246_v45 = vadd.f32 %v245_v40, %v225_v37  ;;  %v286_v48 = vstv %s635_s30 }
  0x2a   : > { %v283_v46 = vadd.f32 %v282_v43, %v280_v42  ;;  %s645_s12 = sld [smem:[#allocation5 + $0xb]]  ;;  %v298_v59 = vstv %s637_s6 }
  0x2b   : > { %v266_v47 = vmul.f32 %v265_v41, %v263_v44  ;;  %v187_v49 = vstv %s401_s0  ;;  %s648_s13 = sld [smem:[#allocation6 + $0x1]] }
  0x2c   : > { %v284_v50 = vmax.f32 %v283_v46, 0.0  ;;  %v188_v51 = vmul.f32 %v187_v49, %v619_v9  ;;  %v206_v52 = vstv %s407_s7  ;;  %s402_s14 = sld [smem:[#allocation5 + $0xc]] }
  0x2d   : > { %v267_v53 = vadd.f32 %v266_v47, %v246_v45  ;;  %v207_v54 = vmul.f32 %v206_v52, %v625_v16  ;;  %v227_v55 = vstv %s413_s3  ;;  %s408_s16 = sld [smem:[#allocation5 + $0xd]] }
  0x2e   : > { %v287_v56 = vmul.f32 %v286_v48, %v284_v50  ;;  %v228_v57 = vmul.f32 %v227_v55, %v633_v28  ;;  %v248_v58 = vstv %s419_s10  ;;  %s414_s17 = sld [smem:[#allocation5 + $0xe]] }
  0x2f   : > { %v208_v60 = vadd.f32 %v207_v54, %v188_v51  ;;  %v249_v61 = vmul.f32 %v248_v58, %v242_v36  ;;  %v269_v62 = vstv %s643_s11  ;;  %s420_s18 = sld [smem:[#allocation5 + $0xf]] }
  0x30   : > { %v288_v63 = vadd.f32 %v287_v56, %v267_v53  ;;  %v290_v0 = vstv %s645_s12  ;;  %s426_s19 = sld [smem:[#allocation5 + $0x10]]  ;;  %v270_v2 = vmul.f32 %v269_v62, %v263_v44 }
  0x31   : > { %v229_v1 = vadd.f32 %v228_v57, %v208_v60  ;;  %s432_s22 = sld [smem:[#allocation5 + $0x11]]  ;;  %v291_v6 = vmul.f32 %v290_v0, %v284_v50  ;;  %v302_v15 = vstv %s648_s13 }
  0x32   : > { %v299_v3 = vadd.f32 %v298_v59, %v288_v63  ;;  %v190_v4 = vstv %s402_s14  ;;  %s435_s23 = sld [smem:[#allocation6 + $0x2]] }
  0x33   : > { %v250_v5 = vadd.f32 %v249_v61, %v229_v1  ;;  %v191_v7 = vmul.f32 %v190_v4, %v619_v9  ;;  %v210_v8 = vstv %s408_s16 }
  0x34   : > { %300 = vst [vmem:[%s660_s21] sm:$0x3] %v299_v3  ;;  %v211_v10 = vmul.f32 %v210_v8, %v625_v16  ;;  %v231_v11 = vstv %s414_s17 }
  0x35   : > { %v271_v12 = vadd.f32 %v270_v2, %v250_v5  ;;  %v232_v13 = vmul.f32 %v231_v11, %v633_v28  ;;  %v252_v14 = vstv %s420_s18 }
  0x36   : > { %v212_v17 = vadd.f32 %v211_v10, %v191_v7  ;;  %v253_v18 = vmul.f32 %v252_v14, %v242_v36  ;;  %v273_v19 = vstv %s426_s19 }
  0x37   : > { %v292_v20 = vadd.f32 %v291_v6, %v271_v12  ;;  %v294_v21 = vstv %s432_s22  ;;  %v274_v9 = vmul.f32 %v273_v19, %v263_v44 }
  0x38   : > { %v233_v22 = vadd.f32 %v232_v13, %v212_v17  ;;  %v295_v25 = vmul.f32 %v294_v21, %v284_v50  ;;  %v307_v26 = vstv %s435_s23 }
  0x39   : > { %v303_v23 = vadd.f32 %v302_v15, %v292_v20 }
  0x3a   : > { %v254_v24 = vadd.f32 %v253_v18, %v233_v22 }
  0x3b   : > { %434 = vst [vmem:[%s660_s21 + $0x2] sm:$0x3] %v303_v23 }
  0x3c   : > { %v275_v16 = vadd.f32 %v274_v9, %v254_v24 }
  0x3e   : > { %v296_v27 = vadd.f32 %v295_v25, %v275_v16 }
  0x40   : > { %v308_v29 = vadd.f32 %v307_v26, %v296_v27 }
  0x42   : > { %436 = vst [vmem:[%s660_s21 + $0x4] sm:$0x3] %v308_v29 }
  0x43 PF: > { %s38_s9 = sadd.s32 1, %s541_s9   ;;  %s684_s1 = smov %s537_s8 }
  0x44   : > { %p35_p5 = scmp.ge.s32.totalorder %s38_s9, 4   ;;  %s685_s8 = smov %s687_s2 }
  0x46   :  { %37 = sbr.rel (!%p35_p5) target bundleno = 13 (0xd), region = 61 }

</bundles_post_ra>
